<compile_context>
chip_gen: v7x
topology: tpu7x:2x2x1
jax: 0.10.0
libtpu: 0.0.40
codegen_flags: <defaults>
</compile_context>

<pallas_src>
import jax
import jax.numpy as jnp
from jax import lax
from jax.experimental import pallas as pl
from jax.experimental.pallas import tpu as pltpu


def _round_up(x, m):
    return ((x + m - 1) // m) * m


def _make_kernel(TB, TV, seq_len):
    """Kernel closure over static tile sizes and the true (unpadded) sequence length."""
    inv_s = 1.0 / float(seq_len)

    def kernel(text_ref, table_ref, w_ref, b_ref, o_ref, acc_ref):
        vi = pl.program_id(1)          # vocab-tile index ("arbitrary" reduction axis)
        nv = pl.num_programs(1)

        @pl.when(vi == 0)
        def _():
            acc_ref[...] = jnp.zeros_like(acc_ref)

        toks = text_ref[...]                                   # [TB, S_pad] int32, -1 = pad
        s_pad = toks.shape[1]
        # Vocab ids covered by this table tile (lane iota, cheap).
        vids = vi * TV + lax.broadcasted_iota(jnp.int32, (1, 1, TV), 2)
        # One-hot compare (VPU) + reduce over seq (XLU): counts[b, v] for this tile.
        onehot = (toks.reshape(TB, s_pad, 1) == vids).astype(jnp.float32)  # [TB, S_pad, TV]
        counts = jnp.sum(onehot, axis=1)                        # [TB, TV] f32 (exact ints)
        # Pooling-as-matmul on the MXU: running seq-sum of embeddings in f32.
        acc_ref[...] += jnp.dot(counts, table_ref[...].astype(jnp.float32),
                                preferred_element_type=jnp.float32)

        @pl.when(vi == nv - 1)
        def _():
            # avg_pool2d over the seq axis == sum / S (true S; pads never counted).
            pooled = acc_ref[...] * inv_s                       # [TB, E_pad]
            out = jnp.dot(pooled, w_ref[...],
                          preferred_element_type=jnp.float32) + b_ref[...]
            o_ref[...] = out.astype(o_ref.dtype)

    return kernel


def wordavg_forward(text, emb_table, fc_w, fc_b, *, tb=128, tv=512):
    """text [B,S] int, emb_table [V,E], fc_w [E,O], fc_b [O]  ->  [B,O] float32."""
    B, S = text.shape
    V, E = emb_table.shape
    E_w, O = fc_w.shape
    assert E_w == E

    # Tile sizes / lane-dense padding.
    TB = min(tb, _round_up(B, 8))          # batch tile (sublane-aligned)
    B_pad = _round_up(B, TB)
    S_pad = _round_up(S, 8)
    TV = min(tv, _round_up(V, 128))        # vocab tile (lane-aligned)
    V_pad = _round_up(V, TV)
    E_pad = _round_up(E, 128)
    O_pad = _round_up(O, 128)

    # Sentinel -1 for padded batch rows / seq positions: it never matches a vocab id,
    # so padded slots contribute nothing to counts (no in-kernel masking needed).
    text_p = jnp.pad(text.astype(jnp.int32),
                     ((0, B_pad - B), (0, S_pad - S)), constant_values=-1)
    table_p = jnp.pad(emb_table, ((0, V_pad - V), (0, E_pad - E)))
    w_p = jnp.pad(fc_w.astype(jnp.float32), ((0, E_pad - E), (0, O_pad - O)))
    b_p = jnp.pad(fc_b.astype(jnp.float32), (0, O_pad - O)).reshape(1, O_pad)

    nb = B_pad // TB
    nv = V_pad // TV

    cost = pl.CostEstimate(
        flops=int(2 * B_pad * S_pad * V_pad          # one-hot compare + count reduce
                  + 2 * B_pad * V_pad * E_pad        # counts @ table (pooling)
                  + 2 * B_pad * E_pad * O_pad),      # pooled @ W (fc)
        transcendentals=0,
        bytes_accessed=int(B_pad * S_pad * 4
                           + V_pad * E_pad * int(table_p.dtype.itemsize)
                           + E_pad * O_pad * 4 + O_pad * 4
                           + B_pad * O_pad * 4),
    )

    out = pl.pallas_call(
        _make_kernel(TB, TV, seq_len=S),
        out_shape=jax.ShapeDtypeStruct((B_pad, O_pad), jnp.float32),
        grid_spec=pltpu.PrefetchScalarGridSpec(
            num_scalar_prefetch=0,
            grid=(nb, nv),
            in_specs=[
                pl.BlockSpec((TB, S_pad), lambda bi, vi: (bi, 0)),    # token ids
                pl.BlockSpec((TV, E_pad), lambda bi, vi: (vi, 0)),    # embedding table tile
                pl.BlockSpec((E_pad, O_pad), lambda bi, vi: (0, 0)),  # fc weight
                pl.BlockSpec((1, O_pad), lambda bi, vi: (0, 0)),      # fc bias
            ],
            out_specs=pl.BlockSpec((TB, O_pad), lambda bi, vi: (bi, 0)),
            scratch_shapes=[pltpu.VMEM((TB, E_pad), jnp.float32)],    # seq-sum accumulator
        ),
        compiler_params=pltpu.CompilerParams(
            dimension_semantics=("parallel", "arbitrary"),
        ),
        cost_estimate=cost,
    )(text_p, table_p, w_p, b_p)

    return out[:B, :O]


def reference_forward(text, emb_table, fc_w, fc_b):
    embedded = jnp.take(emb_table, text, axis=0)
    pooled = jnp.mean(embedded, axis=1)
    return pooled @ fc_w + fc_b[None, :]


if __name__ == "__main__":
    # Small, deterministic setup consistent with the module.
    vocab_size, embedding_dim, output_dim = 300, 32, 8
    pad_idx = 0
    batch, seq = 4, 16

    key = jax.random.PRNGKey(0)
    k_emb, k_w, k_b, k_text = jax.random.split(key, 4)

    emb_table = jax.random.normal(k_emb, (vocab_size, embedding_dim), jnp.float32)
    emb_table = emb_table.at[pad_idx].set(0.0)           # padding_idx row zeroed

    # nn.Linear(embedding_dim, output_dim): weight [O, E], bias [O]; stored here as [E, O].
    bound = 1.0 / float(embedding_dim) ** 0.5
    fc_w = jax.random.uniform(k_w, (embedding_dim, output_dim), jnp.float32, -bound, bound)
    fc_b = jax.random.uniform(k_b, (output_dim,), jnp.float32, -bound, bound)

    text = jax.random.randint(k_text, (batch, seq), 0, vocab_size, jnp.int32)

    # tv=128 -> V_pad=384, three vocab tiles: exercises the cross-tile accumulator.
    out = wordavg_forward(text, emb_table, fc_w, fc_b, tv=128)
    out = jax.block_until_ready(out)

    ref = reference_forward(text, emb_table, fc_w, fc_b)
    assert out.shape == (batch, output_dim)
    assert jnp.allclose(out, ref, atol=1e-4, rtol=1e-4), (out, ref)

    print("KERNEL_OK")
</pallas_src>

<mosaic_0001>
module attributes {stable_mosaic.version = 11 : i64} {
  func.func @kernel(%arg0: i32, %arg1: i32, %arg2: memref<8x16xi32, #tpu.memory_space<vmem>>, %arg3: memref<128x128xf32, #tpu.memory_space<vmem>>, %arg4: memref<128x128xf32, #tpu.memory_space<vmem>>, %arg5: memref<1x128xf32, #tpu.memory_space<vmem>>, %arg6: memref<8x128xf32, #tpu.memory_space<vmem>>, %arg7: memref<8x128xf32, #tpu.memory_space<vmem>>) attributes {dimension_semantics = [#tpu.dimension_semantics<parallel>, #tpu.dimension_semantics<arbitrary>], iteration_bounds = array<i64: 1, 3>, scalar_prefetch = 0 : i64, scratch_operands = 1 : i64, tpu.core_type = #tpu.core_type<tc>, window_params = [{transform_indices = @transform_0, window_bounds = array<i64: 8, 16>}, {transform_indices = @transform_1, window_bounds = array<i64: 128, 128>}, {pipeline_mode = #tpu.pipeline_mode<synchronous>, transform_indices = @transform_2, window_bounds = array<i64: 128, 128>}, {pipeline_mode = #tpu.pipeline_mode<synchronous>, transform_indices = @transform_3, window_bounds = array<i64: 1, 128>}, {transform_indices = @transform_4, window_bounds = array<i64: 8, 128>}]} {
    %c0_i32 = arith.constant 0 : i32
    %0 = arith.cmpi eq, %arg1, %c0_i32 : i32
    %1 = arith.extui %0 : i1 to i32
    %c0_i32_0 = arith.constant 0 : i32
    %2 = arith.cmpi ne, %1, %c0_i32_0 : i32
    scf.if %2 {
      %cst_10 = arith.constant 0.000000e+00 : f32
      %23 = vector.broadcast %cst_10 : f32 to vector<8x128xf32>
      %c0_11 = arith.constant 0 : index
      %c0_12 = arith.constant 0 : index
      %24 = vector.load %arg7[%c0_11, %c0_12] : memref<8x128xf32, #tpu.memory_space<vmem>>, vector<8x128xf32>
      tpu.vector_store %arg7[%c0_11, %c0_12], %23 {strides = array<i32>} : memref<8x128xf32, #tpu.memory_space<vmem>>, vector<8x128xf32>,
    } else {
    }
    %c0 = arith.constant 0 : index
    %c0_1 = arith.constant 0 : index
    %3 = vector.load %arg2[%c0, %c0_1] : memref<8x16xi32, #tpu.memory_space<vmem>>, vector<8x16xi32>
    %c128_i32 = arith.constant 128 : i32
    %4 = arith.muli %arg1, %c128_i32 : i32
    %5 = tpu.iota {dimensions = array<i32: 2>} : vector<1x1x128xi32>
    %6 = vector.broadcast %4 : i32 to vector<1x1x128xi32>
    %7 = arith.addi %6, %5 : vector<1x1x128xi32>
    %8 = vector.shape_cast %3 : vector<8x16xi32> to vector<8x16x1xi32>
    %9 = vector.broadcast %8 : vector<8x16x1xi32> to vector<8x16x128xi32>
    %10 = vector.broadcast %7 : vector<1x1x128xi32> to vector<8x16x128xi32>
    %11 = arith.cmpi eq, %9, %10 : vector<8x16x128xi32>
    %12 = arith.extui %11 : vector<8x16x128xi1> to vector<8x16x128xi32>
    %13 = arith.sitofp %12 : vector<8x16x128xi32> to vector<8x16x128xf32>
    %cst = arith.constant dense<0.000000e+00> : vector<8x128xf32>
    %14 = vector.multi_reduction <add>, %13, %cst [1] : vector<8x16x128xf32> to vector<8x128xf32>
    %c0_2 = arith.constant 0 : index
    %c0_3 = arith.constant 0 : index
    %15 = vector.load %arg7[%c0_2, %c0_3] : memref<8x128xf32, #tpu.memory_space<vmem>>, vector<8x128xf32>
    %c0_4 = arith.constant 0 : index
    %c0_5 = arith.constant 0 : index
    %16 = vector.load %arg3[%c0_4, %c0_5] : memref<128x128xf32, #tpu.memory_space<vmem>>, vector<128x128xf32>
    %cst_6 = arith.constant dense<0.000000e+00> : vector<8x128xf32>
    %17 = tpu.matmul %14, %16, %cst_6 {dimension_numbers = #tpu.dot_dimension_numbers<[1], [0], [0], [1], [0, 0, 1, 1], [], []>} : vector<8x128xf32>, vector<128x128xf32>, vector<8x128xf32> -> vector<8x128xf32>
    %18 = arith.addf %15, %17 : vector<8x128xf32>
    %c0_7 = arith.constant 0 : index
    %c0_8 = arith.constant 0 : index
    %19 = vector.load %arg7[%c0_7, %c0_8] : memref<8x128xf32, #tpu.memory_space<vmem>>, vector<8x128xf32>
    tpu.vector_store %arg7[%c0_7, %c0_8], %18 {strides = array<i32>} : memref<8x128xf32, #tpu.memory_space<vmem>>, vector<8x128xf32>,
    %c2_i32 = arith.constant 2 : i32
    %20 = arith.cmpi eq, %arg1, %c2_i32 : i32
    %21 = arith.extui %20 : i1 to i32
    %c0_i32_9 = arith.constant 0 : i32
    %22 = arith.cmpi ne, %21, %c0_i32_9 : i32
    scf.if %22 {
      %c0_10 = arith.constant 0 : index
      %c0_11 = arith.constant 0 : index
      %23 = vector.load %arg7[%c0_10, %c0_11] : memref<8x128xf32, #tpu.memory_space<vmem>>, vector<8x128xf32>
      %cst_12 = arith.constant 6.250000e-02 : f32
      %24 = vector.broadcast %cst_12 : f32 to vector<8x128xf32>
      %25 = arith.mulf %23, %24 : vector<8x128xf32>
      %c0_13 = arith.constant 0 : index
      %c0_14 = arith.constant 0 : index
      %26 = vector.load %arg4[%c0_13, %c0_14] : memref<128x128xf32, #tpu.memory_space<vmem>>, vector<128x128xf32>
      %cst_15 = arith.constant dense<0.000000e+00> : vector<8x128xf32>
      %27 = tpu.matmul %25, %26, %cst_15 {dimension_numbers = #tpu.dot_dimension_numbers<[1], [0], [0], [1], [0, 0, 1, 1], [], []>} : vector<8x128xf32>, vector<128x128xf32>, vector<8x128xf32> -> vector<8x128xf32>
      %c0_16 = arith.constant 0 : index
      %c0_17 = arith.constant 0 : index
      %28 = vector.load %arg5[%c0_16, %c0_17] : memref<1x128xf32, #tpu.memory_space<vmem>>, vector<1x128xf32>
      %29 = vector.broadcast %28 : vector<1x128xf32> to vector<8x128xf32>
      %30 = arith.addf %27, %29 : vector<8x128xf32>
      %c0_18 = arith.constant 0 : index
      %c0_19 = arith.constant 0 : index
      %31 = vector.load %arg6[%c0_18, %c0_19] : memref<8x128xf32, #tpu.memory_space<vmem>>, vector<8x128xf32>
      tpu.vector_store %arg6[%c0_18, %c0_19], %30 {strides = array<i32>} : memref<8x128xf32, #tpu.memory_space<vmem>>, vector<8x128xf32>,
    } else {
    }
    return
  }
  func.func @transform_0(%arg0: i32, %arg1: i32) -> (i32, i32) {
    %c0_i32 = arith.constant 0 : i32
    %c0_i32_0 = arith.constant 0 : i32
    return %arg0, %c0_i32 : i32, i32
  }
  func.func @transform_1(%arg0: i32, %arg1: i32) -> (i32, i32) {
    %c0_i32 = arith.constant 0 : i32
    %c0_i32_0 = arith.constant 0 : i32
    return %arg1, %c0_i32 : i32, i32
  }
  func.func @transform_2(%arg0: i32, %arg1: i32) -> (i32, i32) {
    %c0_i32 = arith.constant 0 : i32
    %c0_i32_0 = arith.constant 0 : i32
    %c0_i32_1 = arith.constant 0 : i32
    return %c0_i32, %c0_i32_0 : i32, i32
  }
  func.func @transform_3(%arg0: i32, %arg1: i32) -> (i32, i32) {
    %c0_i32 = arith.constant 0 : i32
    %c0_i32_0 = arith.constant 0 : i32
    %c0_i32_1 = arith.constant 0 : i32
    return %c0_i32, %c0_i32_0 : i32, i32
  }
  func.func @transform_4(%arg0: i32, %arg1: i32) -> (i32, i32) {
    %c0_i32 = arith.constant 0 : i32
    %c0_i32_0 = arith.constant 0 : i32
    return %arg0, %c0_i32 : i32, i32
  }
}

</mosaic_0001>

<bundles_post_ra>
// kernel: tpu_custom_call.1
= control target key start
LH: loop header
LB: loop body
LE: loop exit
PB: predicated region body
PF: predicated region fallthrough
CT: control target
= control target key end

     0   :  { %9 = vsyncpa [#allocation4], 0  ;;  %s1553_s0 = inlined_call_operand.hbm [shape: s32[8,16], index: 0, kind: input, shape index: {}]   ;;  %s1554_s1 = inlined_call_operand.hbm [shape: f32[384,128], index: 1, kind: input, shape index: {}]   ;;  %s1555_s2 = inlined_call_operand.hbm [shape: f32[128,128], index: 2, kind: input, shape index: {}]   ;;  %s1556_s3 = inlined_call_operand.vmem [shape: f32[1,128], index: 3, kind: input, shape index: {}]   ;;  %s1557_s4 = inlined_call_operand.hbm [shape: f32[8,128], index: 4, kind: output, shape index: {}]  }
   0x1   :  { %10 = vsyncpa [#allocation7], 0 }
   0x2   :  { %12 = vsyncpa [#allocation7 + $0x1], 0 }
   0x3   :  { %13 = vsyncpa [#allocation5], 0  ;;  %s1259_s15 = smov 0   ;;  %s1261_s16 = smov 0  }
   0x4   :  { %s1263_s17 = smov 0   ;;  %s1265_s18 = smov 0  }
   0x5   :  { %s1267_s19 = smov 0   ;;  %s1269_s20 = smov 0  }
   0x6 LB: > { %s1288_s21 = sadd.s32 4294967295, %s1219_s20   ;;  %p71_p0 = scmp.ne.s32.totalorder %s1207_s17, %s1203_s16  ;;  %s1219_s20 = sphi %s1269_s20, %s19_s20   ;;  %s1215_s19 = sphi %s1267_s19, %s1577_s19   ;;  %s1211_s18 = sphi %s1265_s18, %s1576_s18   ;;  %s1207_s17 = sphi %s1263_s17, %s1575_s17   ;;  %s1203_s16 = sphi %s1261_s16, %s1574_s16   ;;  %s1199_s15 = sphi %s1259_s15, %s1573_s15  }
   0x7   : > { %p72_p1 = scmp.eq.s32.totalorder %s1219_s20, 0  ;;  %p77_p2 = scmp.ne.s32.totalorder %s1203_s16, %s1199_s15 }
   0x8   : > { %p1558_p3 = scmp.eq.s32.totalorder %s1288_s21, 0  ;;  %p765_p4 = scmp.ge.s32.totalorder %s1219_s20, 1 }
   0x9   : > { %p73_p5 = por %p72_p1, %p71_p0  ;;  %p156_p6 = scmp.lt.s32.totalorder %s1219_s20, 4 }
   0xa   : > { %p1299_p7 = por %p1558_p3, %p77_p2  ;;  %s1221_s24 = smov [#allocation8]  }
   0xb   : > { %p1303_p8 = pnand %p765_p4, %p156_p6  ;;  %s181_s25 = sshll.u32 %s1221_s24, 4  ;;  %s182_s25 = int_to_ptr.vmem [resolvable:$true] %s181_s25 }
   0xc   : > { %s1562_s22 = scalar_select %p1299_p7, 1, 0 }
   0xd   : > { %s1563_s23 = scalar_select %p1303_p8, 1, 0 }
   0xe   : > { %p967_p9 = pneg %p1303_p8  ;;  %p980_p11 = scmp.lt.s32.totalorder %s1219_s20, 3 }
   0xf   : > { %s1045_s30 = scalar_lea.hbm %s1555_s2, 2048 }
  0x10   : > { %p1311_p10 = pnand %p967_p9, %p1558_p3  ;;  %p1316_p12 = pnand %p980_p11, %p73_p5 }
  0x11   : > { %p1046_p13 = scmp.ne.s32.totalorder %s1555_s2, %s1045_s30  ;;  %p1052_p4 = scmp.lt.u32.totalorder %s1045_s30, %s1555_s2 }
  0x12   : > { %s1565_s27 = scalar_select %p1316_p12, 1, 0 }
  0x13   : > { %p1047_p0 = pneg %p1311_p10 }
  0x15   : > { %p1048_p1 = pnand %p1047_p0, %p1046_p13 }
  0x17   : > { %p1049_p2 = pneg %p1048_p1 }
  0x19   : > { %p1054_p5 = pnand %p1052_p4, %p1049_p2 }
  0x1b   : > { %1057 = shalt.err (!%p1054_p5)
}
  0x1c   : > { %s1058_s9 = scalar_lea.vmem %s182_s25, 2048  ;;  %p1066_p3 = scmp.lt.s32.totalorder %s182_s25, %s182_s25 }
  0x1d   : > { %p1059_p6 = scmp.ne.s32.totalorder %s182_s25, %s1058_s9  ;;  %p1067_p7 = scmp.lt.s32.totalorder %s1058_s9, %s1058_s9 }
  0x1f   : > { %p1061_p9 = pnand %p1059_p6, %p1047_p0  ;;  %p1068_p8 = por %p1067_p7, %p1066_p3 }
  0x21   : > { %p1062_p11 = pneg %p1061_p9 }
  0x23   : > { %p1069_p12 = pnand %p1068_p8, %p1062_p11 }
  0x25   : > { %1072 = shalt.err (!%p1069_p12)
}
  0x26   : > { %s1222_s10 = smov 128   ;;  %s1223_s11 = smov 8  }
  0x27   : > { %973 = dma.hbm_to_vmem [thread:$0]  (!%p1311_p10), %s1555_s2, 2048, %s182_s25, [#allocation7], %s1222_s10, %s1222_s10, %s1223_s11  }
  0x28   : > { %s1224_s14 = smov [#allocation3]   ;;  %s1073_s29 = scalar_lea.hbm %s1553_s0, 128 }
  0x29   : > { %s171_s15 = sshll.u32 %s1224_s14, 4  ;;  %p1074_p3 = scmp.ne.s32.totalorder %s1553_s0, %s1073_s29  ;;  %s172_s15 = int_to_ptr.vmem [resolvable:$true] %s171_s15 }
  0x2a   : > { %p1080_p12 = scmp.lt.u32.totalorder %s1073_s29, %s1553_s0 }
  0x2b   : > { %p1076_p7 = pnand %p1074_p3, %p1047_p0 }
  0x2d   : > { %p1077_p8 = pneg %p1076_p7 }
  0x2f   : > { %p1082_p13 = pnand %p1080_p12, %p1077_p8 }
  0x31   : > { %1085 = shalt.err (!%p1082_p13)
}
  0x32   : > { %s1086_s25 = scalar_lea.vmem %s172_s15, 128  ;;  %p1094_p5 = scmp.lt.s32.totalorder %s172_s15, %s172_s15 }
  0x33   : > { %p1087_p1 = scmp.ne.s32.totalorder %s172_s15, %s1086_s25  ;;  %p1095_p6 = scmp.lt.s32.totalorder %s1086_s25, %s1086_s25 }
  0x35   : > { %p1089_p2 = pnand %p1087_p1, %p1047_p0  ;;  %p1096_p9 = por %p1095_p6, %p1094_p5 }
  0x37   : > { %p1090_p4 = pneg %p1089_p2 }
  0x39   : > { %p1097_p11 = pnand %p1096_p9, %p1090_p4 }
  0x3b   : > { %1100 = shalt.err (!%p1097_p11)
}
  0x3c   : > { %970 = dma.hbm_to_vmem [thread:$0]  (!%p1311_p10), %s1553_s0, 128, %s172_s15, [#allocation4]  }
  0x3d   : > { %s28_s12 = sadd.s32 1, %s1215_s19  ;;  %s64_s13 = sadd.s32 1, %s1207_s17 }
  0x3e   : > { %p29_p0 = scmp.ge.s32.totalorder %s28_s12, 3  ;;  %s198_s14 = sand.u32 1, %s1219_s20  }
  0x3f   : > { %s200_s24 = sand.u32 1, %s1207_s17   ;;  %s800_s28 = sshll.u32 %s1215_s19, 11 }
  0x40   : > { %s1579_s12 = smov (%p29_p0, %s28_s12), 0  ;;  %s769_s26 = sshll.u32 %s200_s24, 7 }
  0x41   : > { %s61_s29 = ssub.s32 %s1215_s19, %s1579_s12  ;;  %s1377_s6 = scalar_lea.hbm %s1554_s1, %s800_s28 }
  0x42   : > { %p62_p3 = scmp.eq.s32.totalorder %s61_s29, 0  ;;  %s202_s15 = scalar_lea.vmem [#allocation6], %s769_s26 }
  0x43   : > { %s209_s7 = sshll.u32 %s202_s15, 4  ;;  %s1384_s8 = scalar_lea.sflag [#allocation7], %s198_s14  ;;  %s1382_s7 = int_to_ptr.vmem [resolvable:$true] %s209_s7 }
  0x44   : > { %s1380_s25 = scalar_select %p62_p3, %s1207_s17, %s64_s13  }
  0x45   : > { %s1101_s9 = scalar_lea.hbm %s1377_s6, 2048  ;;  %p1566_p7 = scmp.ne.s32.totalorder %s1565_s27, 0 }
  0x46   : > { %p1102_p10 = scmp.ne.s32.totalorder %s1377_s6, %s1101_s9  ;;  %s1106_s29 = scalar_lea.hbm %s1554_s1, 6144 }
  0x47   : > { %p1103_p8 = pneg %p1566_p7  ;;  %p1107_p1 = scmp.lt.u32.totalorder %s1377_s6, %s1554_s1 }
  0x48   : > { %p1108_p2 = scmp.lt.u32.totalorder %s1106_s29, %s1101_s9  ;;  %p1110_p5 = scmp.lt.u32.totalorder %s1101_s9, %s1377_s6 }
  0x49   : > { %p1104_p12 = pnand %p1103_p8, %p1102_p10 }
  0x4a   : > { %p1109_p4 = por %p1108_p2, %p1107_p1 }
  0x4b   : > { %p1105_p13 = pneg %p1104_p12 }
  0x4c   : > { %p1111_p6 = por %p1110_p5, %p1109_p4 }
  0x4e   : > { %p1112_p9 = pnand %p1111_p6, %p1105_p13 }
  0x50   : > { %1115 = shalt.err (!%p1112_p9)
}
  0x51   : > { %s1116_s13 = scalar_lea.vmem %s1382_s7, 2048  ;;  %s1225_s14 = smov [#allocation6]  }
  0x52   : > { %p1117_p11 = scmp.ne.s32.totalorder %s1382_s7, %s1116_s13  ;;  %s1121_s5 = sshll.u32 %s1225_s14, 4  ;;  %s1122_s5 = int_to_ptr.vmem [resolvable:$false] %s1121_s5 }
  0x53   : > { %s1123_s15 = scalar_lea.vmem %s1122_s5, 4096  ;;  %p1124_p10 = scmp.lt.s32.totalorder %s1382_s7, %s1122_s5 }
  0x54   : > { %p1119_p0 = pnand %p1117_p11, %p1103_p8  ;;  %p1125_p12 = scmp.lt.s32.totalorder %s1123_s15, %s1116_s13 }
  0x56   : > { %p1120_p3 = pneg %p1119_p0  ;;  %p1126_p1 = por %p1125_p12, %p1124_p10 }
  0x58   : > { %p1127_p2 = pnand %p1126_p1, %p1120_p3 }
  0x5a   : > { %1130 = shalt.err (!%p1127_p2)
}
  0x5b   : > { %977 = dma.hbm_to_vmem [thread:$0]  (!%p1566_p7), %s1377_s6, 2048, %s1382_s7, %s1384_s8, %s1222_s10, %s1222_s10, %s1223_s11  }
  0x5c   : > { %p1567_p8 = scmp.ne.s32.totalorder %s1563_s23, 0 }
  0x5d   : > { %p1568_p13 = scmp.eq.s32.totalorder (!%p1567_p8), %s1288_s21, 0 }
  0x5e   : > { %221 = sbr.rel (%p1567_p8) target bundleno = 751 (0x2ef), region = 36 }
  0x65   : > { %1182 = dma.done.wait (%p1568_p13), [#allocation4], 128   ;;  %p1569_p4 = pmov %p1568_p13 }
  0x66   : > { %s227_s27 = sand.u32 1, %s1288_s21   ;;  %s229_s9 = sand.u32 1, %s1203_s16  }
  0x67   : > { %1184 = vsyncadd (%p1569_p4), [#allocation4], 4294967168  ;;  %s774_s24 = sshll.u32 %s229_s9, 7  ;;  %s228_s28 = scalar_lea.sflag [#allocation7], %s227_s27 }
  0x68   : > { %s1423_s29 = scalar_lea.vmem [#allocation6], %s774_s24  ;;  %p1570_p5 = scmp.ne.s32.totalorder %s1562_s22, 0 }
  0x6a   : > { %1186 = dma.done.wait (%p1570_p5), %s228_s28, 2048  }
  0x6b   : > { %1188 = vsyncadd (%p1570_p5), %s228_s28, 4294965248  ;;  %p1571_p7 = pmov %p1569_p4 }
  0x6c   : > { %p1572_p6 = pmov %p1569_p4 }
  0x6d   : > { %1190 = dma.done.wait (%p1571_p7), [#allocation7], 2048  }
  0x6e   : > { %1192 = vsyncadd (%p1572_p6), [#allocation7], 4294965248  ;;  %p776_p9 = scmp.ne.s32.totalorder %s1211_s18, 0 }
  0x6f   : > { %v1226_v0 = vmov (!%p776_p9), 0.0  }
  0x70   : > { %259 = sbr.rel (%p776_p9) target bundleno = 119 (0x77), region = 52  ;;  %260 = vst [vmem:[#allocation2] sm:$0xff] (!%p776_p9), %v1226_v0 }
  0x77 PF: > { %v263_v1 = vlaneseq  ;;  %v1437_v3 = vld [vmem:[#allocation3] sm:$0xff]  ;;  %v460_v8 = vld [vmem:[%s1423_s29] sm:$0xff]  ;;  %v461_v9 = vld [vmem:[%s1423_s29 + $0x8] sm:$0xff]  ;;  %v1227_v12 = vmov 0.0|0.0   ;;  %vm1228_vm0 = vmmov 0   ;;  %v1229_v45 = vmov 0.0  }
  0x78   : > { %v906_v11 = vpack.c.bf16 %v461_v9, %v460_v8  ;;  %905 = vmatprep.subr.bf16.mxu0 %v1227_v12  ;;  %v462_v13 = vld [vmem:[%s1423_s29 + $0x10] sm:$0xff]  ;;  %v463_v14 = vld [vmem:[%s1423_s29 + $0x18] sm:$0xff]  ;;  %v464_v18 = vld [vmem:[%s1423_s29 + $0x20] sm:$0xff]  ;;  %867 = vmatprep.mubr.msk.f32.mxu0 %vm1228_vm0, %v1229_v45  ;;  %s777_s22 = sshll.u32 %s1211_s18, 7  ;;  %p794_p11 = scmp.ne.s32.totalorder %s1211_s18, 2 }
  0x79   : > { %v1435_v2 = vshrl.u32 %v263_v1, 7  ;;  %v909_v17 = vpack.c.bf16 %v463_v14, %v462_v13  ;;  %v465_v19 = vld [vmem:[%s1423_s29 + $0x28] sm:$0xff]  ;;  %v466_v23 = vld [vmem:[%s1423_s29 + $0x30] sm:$0xff]  ;;  %v467_v24 = vld [vmem:[%s1423_s29 + $0x38] sm:$0xff]  ;;  %v264_v46 = vand.u32 127, %v263_v1  ;;  %v265_v47 = vstv %s777_s22 }
  0x7a   : > { %907 = vmatpush3.bf16.msra.mxu0 %v906_v11  ;;  %v912_v22 = vpack.c.bf16 %v465_v19, %v464_v18  ;;  %v915_v27 = vpack.c.bf16 %v467_v24, %v466_v23  ;;  %v468_v28 = vld [vmem:[%s1423_s29 + $0x40] sm:$0xff]  ;;  %v469_v29 = vld [vmem:[%s1423_s29 + $0x48] sm:$0xff]  ;;  %v470_v33 = vld [vmem:[%s1423_s29 + $0x50] sm:$0xff] }
  0x7b   : > { %v280_v4 = vsub.s32 1, %v1435_v2  ;;  %v269_v5 = vsub.s32 0, %v1435_v2  ;;  %v291_v10 = vsub.s32 2, %v1435_v2  ;;  %908 = vmatprep.subr.bf16.mxu0 %v1227_v12  ;;  %v302_v16 = vsub.s32 3, %v1435_v2  ;;  %v471_v34 = vld [vmem:[%s1423_s29 + $0x58] sm:$0xff]  ;;  %v472_v38 = vld [vmem:[%s1423_s29 + $0x60] sm:$0xff] }
  0x7c   : > { %v313_v21 = vsub.s32 4, %v1435_v2  ;;  %v324_v26 = vsub.s32 5, %v1435_v2  ;;  %v335_v31 = vsub.s32 6, %v1435_v2  ;;  %v918_v32 = vpack.c.bf16 %v469_v29, %v468_v28  ;;  %v473_v39 = vld [vmem:[%s1423_s29 + $0x68] sm:$0xff]  ;;  %v474_v42 = vld [vmem:[%s1423_s29 + $0x70] sm:$0xff]  ;;  %v475_v43 = vld [vmem:[%s1423_s29 + $0x78] sm:$0xff] }
  0x7d   : > { %v281_v6 = vrot.slane %v1437_v3, %v280_v4  ;;  %v270_v7 = vrot.slane %v1437_v3, %v269_v5  ;;  %v292_v15 = vrot.slane %v1437_v3, %v291_v10  ;;  %v303_v20 = vrot.slane %v1437_v3, %v302_v16 }
  0x7e   : > { %910 = vmatpush3.bf16.msra.mxu0 %v909_v17  ;;  %v314_v25 = vrot.slane %v1437_v3, %v313_v21  ;;  %v325_v30 = vrot.slane %v1437_v3, %v324_v26  ;;  %v336_v35 = vrot.slane %v1437_v3, %v335_v31  ;;  %v346_v36 = vsub.s32 7, %v1435_v2 }
  0x7f   : > { %283 = vbcast.lane.b32.xlu1 %v281_v6, 256  ;;  %272 = vbcast.lane.b32.xlu0 %v270_v7, 256  ;;  %v921_v37 = vpack.c.bf16 %v471_v34, %v470_v33  ;;  %v924_v41 = vpack.c.bf16 %v473_v39, %v472_v38  ;;  %v927_v44 = vpack.c.bf16 %v475_v43, %v474_v42 }
  0x80   : > { %911 = vmatprep.subr.bf16.mxu0 %v1227_v12  ;;  %v347_v40 = vrot.slane %v1437_v3, %v346_v36  ;;  %v1474_v50 = vadd.s32 %v265_v47, %v264_v46 }
  0x82   : > { %913 = vmatpush3.bf16.msra.mxu0 %v912_v22 }
  0x83   : > { %287 = vbcast.lane.b32.xlu1 %v281_v6, 264  ;;  %276 = vbcast.lane.b32.xlu0 %v270_v7, 264 }
  0x84   : > { %914 = vmatprep.subr.bf16.mxu0 %v1227_v12 }
  0x86   : > { %916 = vmatpush3.bf16.msra.mxu0 %v915_v27 }
  0x87   : > { %298 = vbcast.lane.b32.xlu1 %v292_v15, 264  ;;  %294 = vbcast.lane.b32.xlu0 %v292_v15, 256 }
  0x88   : > { %917 = vmatprep.subr.bf16.mxu0 %v1227_v12 }
  0x8a   : > { %919 = vmatpush3.bf16.msra.mxu0 %v918_v32 }
  0x8b   : > { %309 = vbcast.lane.b32.xlu1 %v303_v20, 264  ;;  %305 = vbcast.lane.b32.xlu0 %v303_v20, 256 }
  0x8c   : > { %920 = vmatprep.subr.bf16.mxu0 %v1227_v12 }
  0x8e   : > { %922 = vmatpush3.bf16.msra.mxu0 %v921_v37 }
  0x8f   : > { %320 = vbcast.lane.b32.xlu1 %v314_v25, 264  ;;  %316 = vbcast.lane.b32.xlu0 %v314_v25, 256 }
  0x90   : > { %923 = vmatprep.subr.bf16.mxu0 %v1227_v12 }
  0x92   : > { %925 = vmatpush3.bf16.msra.mxu0 %v924_v41 }
  0x93   : > { %331 = vbcast.lane.b32.xlu1 %v325_v30, 264  ;;  %327 = vbcast.lane.b32.xlu0 %v325_v30, 256 }
  0x94   : > { %926 = vmatprep.subr.bf16.mxu0 %v1227_v12 }
  0x96   : > { %928 = vmatpush3.bf16.msra.mxu0 %v927_v44 }
  0x97   : > { %342 = vbcast.lane.b32.xlu1 %v336_v35, 264  ;;  %338 = vbcast.lane.b32.xlu0 %v336_v35, 256 }
  0x9b   : > { %353 = vbcast.lane.b32.xlu1 %v347_v40, 264  ;;  %349 = vbcast.lane.b32.xlu0 %v347_v40, 256 }
  0xf1   : > { %v284_v48 = vpop.permute.xlu1 %283  ;;  %v273_v49 = vpop.permute.xlu0 %272 }
  0xf2   : > { %vm357_vm3 = vcmp.eq.s32.totalorder %v284_v48, %v1474_v50  ;;  %vm355_vm4 = vcmp.eq.s32.totalorder %v273_v49, %v1474_v50 }
  0xf3   : > { %v780_v57 = vsel %vm357_vm3, 1.0, %v1229_v45  ;;  %v778_v58 = vsel %vm355_vm4, 1.0, %v1229_v45  ;;  %vm488_vm3 = vcmask 1043459   ;;  %vm490_vm4 = vcmask 1044484  }
  0xf5   : > { %v288_v51 = vpop.permute.xlu1 %287  ;;  %v277_v52 = vpop.permute.xlu0 %276 }
  0xf6   : > { %vm358_vm1 = vcmp.eq.s32.totalorder %v288_v51, %v1474_v50  ;;  %vm356_vm2 = vcmp.eq.s32.totalorder %v277_v52, %v1474_v50 }
  0xf7   : > { %v781_v53 = vsel %vm358_vm1, 1.0, %v1229_v45  ;;  %v779_v54 = vsel %vm356_vm2, 1.0, %v1229_v45  ;;  %vm484_vm1 = vcmask 1041409   ;;  %vm486_vm2 = vcmask 1042434  }
  0xf8   : > { %v410_v59 = vadd.f32 %v781_v53, %v780_v57  ;;  %v403_v62 = vadd.f32 %v779_v54, %v778_v58 }
  0xf9   : > { %v299_v55 = vpop.permute.xlu1 %298  ;;  %v295_v56 = vpop.permute.xlu0 %294 }
  0xfa   : > { %vm360_vm5 = vcmp.eq.s32.totalorder %v299_v55, %v1474_v50  ;;  %vm359_vm6 = vcmp.eq.s32.totalorder %v295_v56, %v1474_v50  ;;  %v411_v2 = vrot.slane %v410_v59, 4  ;;  %v404_v4 = vrot.slane %v403_v62, 4 }
  0xfb   : > { %v783_v60 = vsel %vm360_vm5, 1.0, %v1229_v45  ;;  %v782_v61 = vsel %vm359_vm6, 1.0, %v1229_v45  ;;  %vm492_vm5 = vcmask 1045509   ;;  %vm494_vm6 = vcmask 1046534  }
  0xfc   : > { %v417_v63 = vadd.f32 %v783_v60, %v782_v61  ;;  %v412_v10 = vadd.f32 %v411_v2, %v410_v59  ;;  %v405_v13 = vadd.f32 %v404_v4, %v403_v62 }
  0xfd   : > { %v310_v0 = vpop.permute.xlu1 %309  ;;  %v306_v1 = vpop.permute.xlu0 %305 }
  0xfe   : > { %vm362_vm7 = vcmp.eq.s32.totalorder %v310_v0, %v1474_v50  ;;  %vm361_vm8 = vcmp.eq.s32.totalorder %v306_v1, %v1474_v50  ;;  %v418_v6 = vrot.slane %v417_v63, 4  ;;  %v413_v20 = vrot.slane %v412_v10, 2 }
  0xff   : > { %v785_v3 = vsel %vm362_vm7, 1.0, %v1229_v45  ;;  %v784_v5 = vsel %vm361_vm8, 1.0, %v1229_v45  ;;  %v406_v24 = vrot.slane %v405_v13, 2  ;;  %vm496_vm7 = vcmask 1047559  }
 0x100   : > { %v424_v7 = vadd.f32 %v785_v3, %v784_v5  ;;  %v419_v15 = vadd.f32 %v418_v6, %v417_v63  ;;  %v414_v32 = vadd.f32 %v413_v20, %v412_v10  ;;  %v577_v20 = vld [vmem:[#allocation8] sm:$0xff] (!%p794_p11)  ;;  %vm1231_vm8 = vmmov (!%p794_p11), 0  }
 0x101   : > { %v321_v8 = vpop.permute.xlu1 %320  ;;  %v317_v9 = vpop.permute.xlu0 %316  ;;  %v407_v36 = vadd.f32 %v406_v24, %v405_v13 }
 0x102   : > { %vm364_vm9 = vcmp.eq.s32.totalorder %v321_v8, %v1474_v50  ;;  %v425_v11 = vrot.slane %v424_v7, 4  ;;  %vm363_vm10 = vcmp.eq.s32.totalorder %v317_v9, %v1474_v50  ;;  %v420_v26 = vrot.slane %v419_v15, 2 }
 0x103   : > { %v787_v12 = vsel %vm364_vm9, 1.0, %v1229_v45  ;;  %v786_v14 = vsel %vm363_vm10, 1.0, %v1229_v45  ;;  %v415_v46 = vrot.slane %v414_v32, 1  ;;  %v408_v51 = vrot.slane %v407_v36, 1 }
 0x104   : > { %v426_v16 = vadd.f32 %v425_v11, %v424_v7  ;;  %v431_v17 = vadd.f32 %v787_v12, %v786_v14  ;;  %v421_v39 = vadd.f32 %v420_v26, %v419_v15  ;;  %v1232_v26 = vmov (!%p794_p11), 0.0  }
 0x105   : > { %v332_v18 = vpop.permute.xlu1 %331  ;;  %v328_v19 = vpop.permute.xlu0 %327  ;;  %v416_v59 = vadd.f32 %v415_v46, %v414_v32  ;;  %v409_v61 = vadd.f32 %v408_v51, %v407_v36  ;;  %v584_v32 = vld [vmem:[#allocation8 + $0x38] sm:$0xff] (!%p794_p11) }
 0x106   : > { %vm366_vm11 = vcmp.eq.s32.totalorder %v332_v18, %v1474_v50  ;;  %vm365_vm12 = vcmp.eq.s32.totalorder %v328_v19, %v1474_v50  ;;  %v432_v21 = vrot.slane %v431_v17, 4  ;;  %v427_v27 = vrot.slane %v426_v16, 2 }
 0x107   : > { %v789_v22 = vsel %vm366_vm11, 1.0, %v1229_v45  ;;  %v788_v23 = vsel %vm365_vm12, 1.0, %v1229_v45  ;;  %v422_v55 = vrot.slane %v421_v39, 1  ;;  %v485_v4 = vsel %vm484_vm1, %v416_v59, %v409_v61 }
 0x108   : > { %v438_v25 = vadd.f32 %v789_v22, %v788_v23  ;;  %v433_v28 = vadd.f32 %v432_v21, %v431_v17  ;;  %v428_v40 = vadd.f32 %v427_v27, %v426_v16  ;;  %v459_v16 = vld [vmem:[#allocation2] sm:$0xff]  ;;  %v578_v21 = vld [vmem:[#allocation8 + $0x8] sm:$0xff] (!%p794_p11)  ;;  %v1230_v23 = vmov (!%p794_p11), 0.0|0.0  }
 0x109   : > { %v343_v29 = vpop.permute.xlu1 %342  ;;  %v339_v30 = vpop.permute.xlu0 %338  ;;  %v423_v0 = vadd.f32 %v422_v55, %v421_v39  ;;  %v579_v22 = vld [vmem:[#allocation8 + $0x10] sm:$0xff] (!%p794_p11)  ;;  %929 = vmatprep.subr.bf16.mxu0 (!%p794_p11), %v1230_v23  ;;  %v930_v24 = vpack.c.bf16 (!%p794_p11), %v578_v21, %v577_v20 }
 0x10a   : > { %v439_v31 = vrot.slane %v438_v25, 4  ;;  %vm368_vm13 = vcmp.eq.s32.totalorder %v343_v29, %v1474_v50  ;;  %vm367_vm14 = vcmp.eq.s32.totalorder %v339_v30, %v1474_v50  ;;  %v434_v33 = vrot.slane %v433_v28, 2  ;;  %v582_v29 = vld [vmem:[#allocation8 + $0x28] sm:$0xff] (!%p794_p11) }
 0x10b   : > { %v791_v34 = vsel %vm368_vm13, 1.0, %v1229_v45  ;;  %v790_v35 = vsel %vm367_vm14, 1.0, %v1229_v45  ;;  %v429_v56 = vrot.slane %v428_v40, 1  ;;  %v487_v8 = vsel %vm486_vm2, %v423_v0, %v485_v4 }
 0x10c   : > { %v440_v37 = vadd.f32 %v439_v31, %v438_v25  ;;  %v445_v38 = vadd.f32 %v791_v34, %v790_v35  ;;  %v435_v47 = vadd.f32 %v434_v33, %v433_v28  ;;  %v580_v25 = vld [vmem:[#allocation8 + $0x18] sm:$0xff] (!%p794_p11)  ;;  %v581_v28 = vld [vmem:[#allocation8 + $0x20] sm:$0xff] (!%p794_p11)  ;;  %v583_v31 = vld [vmem:[#allocation8 + $0x30] sm:$0xff] (!%p794_p11) }
 0x10d   : > { %v354_v41 = vpop.permute.xlu1 %353  ;;  %v350_v42 = vpop.permute.xlu0 %349  ;;  %v430_v1 = vadd.f32 %v429_v56, %v428_v40  ;;  %v933_v27 = vpack.c.bf16 (!%p794_p11), %v580_v25, %v579_v22  ;;  %v936_v30 = vpack.c.bf16 (!%p794_p11), %v582_v29, %v581_v28  ;;  %v939_v33 = vpack.c.bf16 (!%p794_p11), %v584_v32, %v583_v31  ;;  %v585_v34 = vld [vmem:[#allocation8 + $0x40] sm:$0xff] (!%p794_p11)  ;;  %v586_v35 = vld [vmem:[#allocation8 + $0x48] sm:$0xff] (!%p794_p11) }
 0x10e   : > { %v441_v43 = vrot.slane %v440_v37, 2  ;;  %v446_v44 = vrot.slane %v445_v38, 4  ;;  %vm370_vm15 = vcmp.eq.s32.totalorder %v354_v41, %v1474_v50  ;;  %vm369_vm0 = vcmp.eq.s32.totalorder %v350_v42, %v1474_v50  ;;  %v589_v40 = vld [vmem:[#allocation8 + $0x60] sm:$0xff] (!%p794_p11)  ;;  %v590_v41 = vld [vmem:[#allocation8 + $0x68] sm:$0xff] (!%p794_p11) }
 0x10f   : > { %v793_v48 = vsel %vm370_vm15, 1.0, %v1229_v45  ;;  %v792_v49 = vsel %vm369_vm0, 1.0, %v1229_v45  ;;  %v436_v60 = vrot.slane %v435_v47, 1  ;;  %v489_v10 = vsel %vm488_vm3, %v430_v1, %v487_v8 }
 0x110   : > { %v442_v52 = vadd.f32 %v441_v43, %v440_v37  ;;  %v447_v53 = vadd.f32 %v446_v44, %v445_v38  ;;  %v452_v54 = vadd.f32 %v793_v48, %v792_v49  ;;  %v942_v36 = vpack.c.bf16 (!%p794_p11), %v586_v35, %v585_v34  ;;  %v587_v37 = vld [vmem:[#allocation8 + $0x50] sm:$0xff] (!%p794_p11)  ;;  %v588_v38 = vld [vmem:[#allocation8 + $0x58] sm:$0xff] (!%p794_p11) }
 0x111   : > { %v437_v45 = vadd.f32 %v436_v60, %v435_v47  ;;  %v945_v39 = vpack.c.bf16 (!%p794_p11), %v588_v38, %v587_v37  ;;  %v948_v42 = vpack.c.bf16 (!%p794_p11), %v590_v41, %v589_v40  ;;  %v591_v43 = vld [vmem:[#allocation8 + $0x70] sm:$0xff] (!%p794_p11)  ;;  %v592_v44 = vld [vmem:[#allocation8 + $0x78] sm:$0xff] (!%p794_p11) }
 0x112   : > { %v448_v57 = vrot.slane %v447_v53, 2  ;;  %v453_v58 = vrot.slane %v452_v54, 4  ;;  %v443_v62 = vrot.slane %v442_v52, 1  ;;  %v951_v46 = vpack.c.bf16 (!%p794_p11), %v592_v44, %v591_v43  ;;  %v795_v49 = vld [vmem:[%s1556_s3] ss:$0 sm:$0xff] (!%p794_p11) }
 0x113   : > { %v491_v11 = vsel %vm490_vm4, %v437_v45, %v489_v10 }
 0x114   : > { %v449_v63 = vadd.f32 %v448_v57, %v447_v53  ;;  %v454_v50 = vadd.f32 %v453_v58, %v452_v54  ;;  %v444_v5 = vadd.f32 %v443_v62, %v442_v52 }
 0x116   : > { %v450_v2 = vrot.slane %v449_v63, 1  ;;  %v455_v3 = vrot.slane %v454_v50, 2  ;;  %v493_v13 = vsel %vm492_vm5, %v444_v5, %v491_v11 }
 0x118   : > { %v456_v6 = vadd.f32 %v455_v3, %v454_v50  ;;  %v451_v7 = vadd.f32 %v450_v2, %v449_v63 }
 0x11a   : > { %v457_v9 = vrot.slane %v456_v6, 1  ;;  %v495_v14 = vsel %vm494_vm6, %v451_v7, %v493_v13 }
 0x11c   : > { %v458_v12 = vadd.f32 %v457_v9, %v456_v6 }
 0x11e   : > { %v497_v15 = vsel %vm496_vm7, %v458_v12, %v495_v14 }
 0x11f   : > { %868 = vmatmul.mubr.f32.vlgmr.msra.gmra.mrb[0].mxu0 %v497_v15 }
 0x120   : > { %902 = vmatprep.mubr.msk.f32.mxu0 (!%p794_p11), %vm1231_vm8, %v1232_v26  ;;  %931 = vmatpush3.bf16.msra.mxu0 (!%p794_p11), %v930_v24 }
 0x121   : > { %932 = vmatprep.subr.bf16.mxu0 (!%p794_p11), %v1230_v23 }
 0x124   : > { %934 = vmatpush3.bf16.msra.mxu0 (!%p794_p11), %v933_v27 }
 0x125   : > { %935 = vmatprep.subr.bf16.mxu0 (!%p794_p11), %v1230_v23 }
 0x128   : > { %937 = vmatpush3.bf16.msra.mxu0 (!%p794_p11), %v936_v30 }
 0x129   : > { %938 = vmatprep.subr.bf16.mxu0 (!%p794_p11), %v1230_v23 }
 0x12c   : > { %940 = vmatpush3.bf16.msra.mxu0 (!%p794_p11), %v939_v33 }
 0x12d   : > { %941 = vmatprep.subr.bf16.mxu0 (!%p794_p11), %v1230_v23 }
 0x130   : > { %943 = vmatpush3.bf16.msra.mxu0 (!%p794_p11), %v942_v36 }
 0x131   : > { %944 = vmatprep.subr.bf16.mxu0 (!%p794_p11), %v1230_v23 }
 0x134   : > { %946 = vmatpush3.bf16.msra.mxu0 (!%p794_p11), %v945_v39 }
 0x135   : > { %947 = vmatprep.subr.bf16.mxu0 (!%p794_p11), %v1230_v23 }
 0x138   : > { %949 = vmatpush3.bf16.msra.mxu0 (!%p794_p11), %v948_v42 }
 0x139   : > { %950 = vmatprep.subr.bf16.mxu0 (!%p794_p11), %v1230_v23 }
 0x13c   : > { %952 = vmatpush3.bf16.msra.mxu0 (!%p794_p11), %v951_v46 }
 0x1ef   : > { %574 = sbr.rel (%p794_p11) target bundleno = 726 (0x2d6), region = 56 }
 0x1f2   : > { %v565_v17 = vpop.f32.mrb[0].mxu0 }
 0x1f3   : > { %v569_v18 = vadd.f32 %v565_v17, %v459_v16  ;;  %v869_v19 = vpop.f32.mrb[1].mxu0 }
 0x1f5   : > { %570 = vst [vmem:[#allocation2] sm:$0xff] %v569_v18 }
 0x1fc   : > { %v575_v47 = vld [vmem:[#allocation2] sm:$0xff] }
 0x1fd   : > { %v576_v48 = vmul.f32 0.0625, %v575_v47 }
 0x1ff   : > { %903 = vmatmul.mubr.f32.vlgmr.msra.gmra.mrb[0].mxu0 %v576_v48 }
 0x2d2   : > { %v666_v51 = vpop.f32.mrb[0].mxu0 }
 0x2d3   : > { %v667_v52 = vadd.f32 %v795_v49, %v666_v51  ;;  %v904_v53 = vpop.f32.mrb[1].mxu0 }
 0x2d5   : > { %670 = vst [vmem:[#allocation9] sm:$0xff] %v667_v52 }
 0x2d6 PF: > { %p983_p0 = scmp.eq.s32.totalorder %s1288_s21, 2  ;;  %s1233_s10 = smov [#allocation9]  }
 0x2d7   : > { %s680_s11 = sshll.u32 %s1233_s10, 4  ;;  %s681_s11 = int_to_ptr.vmem [resolvable:$true] %s680_s11 }
 0x2d8   : > { %s1131_s6 = scalar_lea.vmem %s681_s11, 128  ;;  %p1138_p1 = scmp.lt.s32.totalorder %s681_s11, %s681_s11 }
 0x2d9   : > { %p1132_p3 = scmp.ne.s32.totalorder %s681_s11, %s1131_s6  ;;  %p1139_p2 = scmp.lt.s32.totalorder %s1131_s6, %s1131_s6 }
 0x2db   : > { %p1133_p10 = pnand %p1132_p3, %p983_p0  ;;  %p1140_p8 = por %p1139_p2, %p1138_p1 }
 0x2dd   : > { %p1134_p12 = pneg %p1133_p10 }
 0x2df   : > { %p1141_p13 = pnand %p1140_p8, %p1134_p12 }
 0x2e1   : > { %1144 = shalt.err (!%p1141_p13)
}
 0x2e2   : > { %s1145_s26 = scalar_lea.hbm %s1557_s4, 128 }
 0x2e3   : > { %p1146_p4 = scmp.ne.s32.totalorder %s1557_s4, %s1145_s26  ;;  %p1151_p6 = scmp.lt.u32.totalorder %s1145_s26, %s1557_s4 }
 0x2e5   : > { %p1147_p5 = pnand %p1146_p4, %p983_p0 }
 0x2e7   : > { %p1148_p7 = pneg %p1147_p5 }
 0x2e9   : > { %p1153_p9 = pnand %p1151_p6, %p1148_p7 }
 0x2eb   : > { %1156 = shalt.err (!%p1153_p9)
}
 0x2ec   : > { %964 = dma.vmem_to_hbm [thread:$0]  (%p983_p0), %s681_s11, 128, %s1557_s4, [#allocation5]  }
 0x2ed   : > { %1194 = dma.done.wait (%p983_p0), [#allocation5], 128  }
 0x2ee   : > { %1196 = vsyncadd (%p983_p0), [#allocation5], 4294967168 }
 0x2ef PF: > { %s19_s20 = sadd.s32 1, %s1219_s20   ;;  %s1573_s15 = smov %s1203_s16 }
 0x2f0   : > { %p16_p11 = scmp.ge.s32.totalorder %s19_s20, 5   ;;  %s1574_s16 = smov %s1207_s17 }
 0x2f1   : > { %s1575_s17 = smov %s1380_s25  ;;  %s1576_s18 = smov %s1215_s19 }
 0x2f2   : > { %s1577_s19 = smov %s1579_s12  ;;  %18 = sbr.rel (!%p16_p11) target bundleno = 6 (0x6), region = 92 }
 0x2f9   :  { %693 = vsyncpa [#allocation4], 1 }
 0x2fa   :  { %695 = vsyncpa [#allocation4 + $0x1], 1 }
 0x2fb   :  { %696 = vsyncpa [#allocation7], 1 }
 0x2fc   :  { %698 = vsyncpa [#allocation7 + $0x1], 1 }
 0x2fd   :  { %699 = vsyncpa [#allocation5], 1 }
 0x2fe   :  { %701 = vsyncpa [#allocation5 + $0x1], 1 }

</bundles_post_ra>
